<compile_context>
chip_gen: v7x
topology: tpu7x:2x2x1
jax: 0.10.0
libtpu: 0.0.40
codegen_flags: <defaults>
</compile_context>

<pallas_src>
import jax
import jax.numpy as jnp
from jax.experimental import pallas as pl
from jax.experimental.pallas import tpu as pltpu


def attn_kernel(si_ref, yts_ref, wsi_ref, bsi_ref, wyi_ref, byi_ref,
                wa_ref, ba_ref, w_out_ref, si_out_ref):
    # si_ref : (TB, S)        yts_ref: (TB, L, Y)
    # wsi_ref: (S, S)         bsi_ref: (1, S)
    # wyi_ref: (Y, S)         byi_ref: (1, S)
    # wa_ref : (1, S)         ba_ref : (1, 1)
    # w_out_ref : (TB, L)     si_out_ref: (TB, Y)
    tb, L, Y = yts_ref.shape
    S = si_ref.shape[1]

    yts3 = yts_ref[...]                                  # (TB, L, Y)
    ytsf = yts3.reshape(tb * L, Y)                       # row-dense for the MXU

    # yi_dense over all TB*L positions in one matmul        -> (TB*L, S)
    y_proj = jnp.dot(ytsf, wyi_ref[...],
                     preferred_element_type=jnp.float32) + byi_ref[...]
    # si_dense over all TB decoder states in one matmul      -> (TB, S)
    s_proj = jnp.dot(si_ref[...], wsi_ref[...],
                     preferred_element_type=jnp.float32) + bsi_ref[...]

    # h = yi_dense(yts) + si_dense(si_1) broadcast over the sequence axis
    h = y_proj.reshape(tb, L, S) + s_proj[:, None, :]    # (TB, L, S)

    # attn_weights: Linear(S, 1) == contract over the lane (feature) axis.
    # VPU multiply + lane reduce; an N=1 MXU matmul would waste the array and
    # force a column->row relayout of the logits.
    wa_row = wa_ref[...].reshape(1, 1, S)                # (1, 1, S)
    e = jnp.sum(h * wa_row, axis=-1) + ba_ref[...]       # (TB, L), lane-dense

    # softmax over the sequence axis (last / lane axis)
    m = jnp.max(e, axis=-1, keepdims=True)               # (TB, 1)
    p = jnp.exp(e - m)                                   # (TB, L)
    denom = jnp.sum(p, axis=-1, keepdims=True)           # (TB, 1)
    w = p / denom                                        # exact; keeps 1e-5 tolerance

    w_out_ref[...] = w.astype(w_out_ref.dtype)           # lane-dense (TB, L) store

    # bmm(weights, yts) on the MXU: (TB, 1, L) @ (TB, L, Y) -> (TB, 1, Y)
    si_new = jnp.einsum('bql,bly->bqy', w[:, None, :], yts3,
                        preferred_element_type=jnp.float32)
    si_out_ref[...] = si_new[:, 0, :].astype(si_out_ref.dtype)


def seq2seq_attention(si_1, yts, params, *, tb=None):
    B, S = si_1.shape
    _, L, Y = yts.shape

    # Batch tile: default = whole batch in a single grid step (best for small B).
    # If tiling (tb < B), tb must be a multiple of 8 to satisfy the (8, 128) block rule.
    if tb is None:
        tb = B
    assert B % tb == 0 and (tb == B or tb % 8 == 0)

    # Pre-transpose PyTorch-convention weights (out, in) -> (in, out).
    wsi_t = params["W_si"].T                      # (S, S)
    wyi_t = params["W_yi"].T                      # (Y, S)
    wa = params["W_a"].reshape(1, S)              # keep natural (1, S) row form
    b_si = params["b_si"].reshape(1, S)
    b_yi = params["b_yi"].reshape(1, S)
    b_a = params["b_a"].reshape(1, 1)

    w_2d, si_new = pl.pallas_call(
        attn_kernel,
        out_shape=(
            jax.ShapeDtypeStruct((B, L), jnp.float32),
            jax.ShapeDtypeStruct((B, Y), jnp.float32),
        ),
        grid_spec=pltpu.PrefetchScalarGridSpec(
            num_scalar_prefetch=0,
            grid=(B // tb,),
            in_specs=[
                pl.BlockSpec((tb, S), lambda i: (i, 0)),        # si_1
                pl.BlockSpec((tb, L, Y), lambda i: (i, 0, 0)),  # yts
                # Constant-index weight/bias blocks. For large S, add
                # pipeline_mode=pl.Buffered(1) to single-buffer them.
                pl.BlockSpec((S, S), lambda i: (0, 0)),         # W_si^T
                pl.BlockSpec((1, S), lambda i: (0, 0)),         # b_si
                pl.BlockSpec((Y, S), lambda i: (0, 0)),         # W_yi^T
                pl.BlockSpec((1, S), lambda i: (0, 0)),         # b_yi
                pl.BlockSpec((1, S), lambda i: (0, 0)),         # W_a (row)
                pl.BlockSpec((1, 1), lambda i: (0, 0)),         # b_a
            ],
            out_specs=[
                pl.BlockSpec((tb, L), lambda i: (i, 0)),        # softmax weights (row form)
                pl.BlockSpec((tb, Y), lambda i: (i, 0)),        # new hidden state
            ],
        ),
        compiler_params=pltpu.CompilerParams(
            dimension_semantics=("parallel",)),
    )(si_1, yts, wsi_t, b_si, wyi_t, b_yi, wa, b_a)

    weights = w_2d.reshape(B, 1, L)   # matches PyTorch (B, 1, L); free reshape, no transpose
    return weights, si_new            # si: (B, Y) == .squeeze() for B > 1


def init_params(key, s_dim, y_dim):
    """Deterministic PyTorch-Linear-style init: U(-1/sqrt(fan_in), +1/sqrt(fan_in))."""
    ks = jax.random.split(key, 6)

    def uni(k, shape, fan_in):
        bound = 1.0 / jnp.sqrt(fan_in)
        return jax.random.uniform(k, shape, jnp.float32, -bound, bound)

    return {
        "W_si": uni(ks[0], (s_dim, s_dim), s_dim),   # Linear(S, S)
        "b_si": uni(ks[1], (s_dim,), s_dim),
        "W_yi": uni(ks[2], (s_dim, y_dim), y_dim),   # Linear(Y, S)
        "b_yi": uni(ks[3], (s_dim,), y_dim),
        "W_a":  uni(ks[4], (1, s_dim), s_dim),       # Linear(S, 1)
        "b_a":  uni(ks[5], (1,), s_dim),
    }


def reference(si_1, yts, p):
    """Pure-JAX reference mirroring the PyTorch forward."""
    s_proj = si_1[:, None, :] @ p["W_si"].T + p["b_si"]          # (B, 1, S)
    y_proj = yts @ p["W_yi"].T + p["b_yi"]                       # (B, L, S)
    eij = (s_proj + y_proj) @ p["W_a"].T + p["b_a"]              # (B, L, 1)
    eij = jnp.transpose(eij, (0, 2, 1))                          # (B, 1, L)
    w = jax.nn.softmax(eij, axis=-1)
    si = jnp.einsum("bol,bly->boy", w, yts)[:, 0, :]             # (B, Y)
    return w, si


if __name__ == "__main__":
    # config: encoder_h_dim[-1]=16 -> S=32 ; encoder_x_dim[-1]=32 -> Y=32
    B, L, S, Y = 2, 8, 32, 32

    key = jax.random.PRNGKey(0)
    k_si, k_yts, k_par = jax.random.split(key, 3)

    si_1 = jax.random.normal(k_si, (B, S), jnp.float32)
    yts = jax.random.normal(k_yts, (B, L, Y), jnp.float32)
    params = init_params(k_par, S, Y)

    weights, si_new = seq2seq_attention(si_1, yts, params)
    jax.block_until_ready((weights, si_new))

    w_ref, si_ref = reference(si_1, yts, params)
    assert weights.shape == (B, 1, L) and si_new.shape == (B, Y)
    assert jnp.allclose(weights, w_ref, atol=1e-5, rtol=1e-5)
    assert jnp.allclose(si_new, si_ref, atol=1e-5, rtol=1e-5)

    print("KERNEL_OK")
</pallas_src>

<mosaic_0001>
module attributes {stable_mosaic.version = 11 : i64} {
  func.func @attn_kernel(%arg0: i32, %arg1: memref<2x32xf32, #tpu.memory_space<vmem>>, %arg2: memref<2x8x32xf32, #tpu.memory_space<vmem>>, %arg3: memref<32x32xf32, #tpu.memory_space<vmem>>, %arg4: memref<1x32xf32, #tpu.memory_space<vmem>>, %arg5: memref<32x32xf32, #tpu.memory_space<vmem>>, %arg6: memref<1x32xf32, #tpu.memory_space<vmem>>, %arg7: memref<1x32xf32, #tpu.memory_space<vmem>>, %arg8: memref<1x1xf32, #tpu.memory_space<vmem>>, %arg9: memref<2x8xf32, #tpu.memory_space<vmem>>, %arg10: memref<2x32xf32, #tpu.memory_space<vmem>>) attributes {dimension_semantics = [#tpu.dimension_semantics<parallel>], iteration_bounds = array<i64: 1>, scalar_prefetch = 0 : i64, scratch_operands = 0 : i64, tpu.core_type = #tpu.core_type<tc>, window_params = [{transform_indices = @transform_0, window_bounds = array<i64: 2, 32>}, {transform_indices = @transform_1, window_bounds = array<i64: 2, 8, 32>}, {pipeline_mode = #tpu.pipeline_mode<synchronous>, transform_indices = @transform_2, window_bounds = array<i64: 32, 32>}, {pipeline_mode = #tpu.pipeline_mode<synchronous>, transform_indices = @transform_3, window_bounds = array<i64: 1, 32>}, {pipeline_mode = #tpu.pipeline_mode<synchronous>, transform_indices = @transform_4, window_bounds = array<i64: 32, 32>}, {pipeline_mode = #tpu.pipeline_mode<synchronous>, transform_indices = @transform_5, window_bounds = array<i64: 1, 32>}, {pipeline_mode = #tpu.pipeline_mode<synchronous>, transform_indices = @transform_6, window_bounds = array<i64: 1, 32>}, {pipeline_mode = #tpu.pipeline_mode<synchronous>, transform_indices = @transform_7, window_bounds = array<i64: 1, 1>}, {transform_indices = @transform_8, window_bounds = array<i64: 2, 8>}, {transform_indices = @transform_9, window_bounds = array<i64: 2, 32>}]} {
    %c0 = arith.constant 0 : index
    %c0_0 = arith.constant 0 : index
    %c0_1 = arith.constant 0 : index
    %0 = vector.load %arg2[%c0, %c0_0, %c0_1] : memref<2x8x32xf32, #tpu.memory_space<vmem>>, vector<2x8x32xf32>
    %1 = vector.shape_cast %0 : vector<2x8x32xf32> to vector<16x32xf32>
    %c0_2 = arith.constant 0 : index
    %c0_3 = arith.constant 0 : index
    %2 = vector.load %arg5[%c0_2, %c0_3] : memref<32x32xf32, #tpu.memory_space<vmem>>, vector<32x32xf32>
    %cst = arith.constant dense<0.000000e+00> : vector<16x32xf32>
    %3 = tpu.matmul %1, %2, %cst {dimension_numbers = #tpu.dot_dimension_numbers<[1], [0], [0], [1], [0, 0, 1, 1], [], []>} : vector<16x32xf32>, vector<32x32xf32>, vector<16x32xf32> -> vector<16x32xf32>
    %c0_4 = arith.constant 0 : index
    %c0_5 = arith.constant 0 : index
    %4 = vector.load %arg6[%c0_4, %c0_5] : memref<1x32xf32, #tpu.memory_space<vmem>>, vector<1x32xf32>
    %5 = vector.broadcast %4 : vector<1x32xf32> to vector<16x32xf32>
    %6 = arith.addf %3, %5 : vector<16x32xf32>
    %c0_6 = arith.constant 0 : index
    %c0_7 = arith.constant 0 : index
    %7 = vector.load %arg1[%c0_6, %c0_7] : memref<2x32xf32, #tpu.memory_space<vmem>>, vector<2x32xf32>
    %c0_8 = arith.constant 0 : index
    %c0_9 = arith.constant 0 : index
    %8 = vector.load %arg3[%c0_8, %c0_9] : memref<32x32xf32, #tpu.memory_space<vmem>>, vector<32x32xf32>
    %cst_10 = arith.constant dense<0.000000e+00> : vector<2x32xf32>
    %9 = tpu.matmul %7, %8, %cst_10 {dimension_numbers = #tpu.dot_dimension_numbers<[1], [0], [0], [1], [0, 0, 1, 1], [], []>} : vector<2x32xf32>, vector<32x32xf32>, vector<2x32xf32> -> vector<2x32xf32>
    %c0_11 = arith.constant 0 : index
    %c0_12 = arith.constant 0 : index
    %10 = vector.load %arg4[%c0_11, %c0_12] : memref<1x32xf32, #tpu.memory_space<vmem>>, vector<1x32xf32>
    %11 = vector.broadcast %10 : vector<1x32xf32> to vector<2x32xf32>
    %12 = arith.addf %9, %11 : vector<2x32xf32>
    %13 = vector.shape_cast %6 : vector<16x32xf32> to vector<2x8x32xf32>
    %14 = vector.shape_cast %12 : vector<2x32xf32> to vector<2x1x32xf32>
    %15 = vector.broadcast %14 : vector<2x1x32xf32> to vector<2x8x32xf32>
    %16 = arith.addf %13, %15 : vector<2x8x32xf32>
    %c0_13 = arith.constant 0 : index
    %c0_14 = arith.constant 0 : index
    %17 = vector.load %arg7[%c0_13, %c0_14] : memref<1x32xf32, #tpu.memory_space<vmem>>, vector<1x32xf32>
    %18 = vector.shape_cast %17 : vector<1x32xf32> to vector<1x1x32xf32>
    %19 = vector.broadcast %18 : vector<1x1x32xf32> to vector<2x8x32xf32>
    %20 = arith.mulf %16, %19 : vector<2x8x32xf32>
    %cst_15 = arith.constant dense<0.000000e+00> : vector<2x8xf32>
    %21 = vector.multi_reduction <add>, %20, %cst_15 [2] : vector<2x8x32xf32> to vector<2x8xf32>
    %c0_16 = arith.constant 0 : index
    %c0_17 = arith.constant 0 : index
    %22 = vector.load %arg8[%c0_16, %c0_17] : memref<1x1xf32, #tpu.memory_space<vmem>>, vector<1x1xf32>
    %23 = vector.broadcast %22 : vector<1x1xf32> to vector<2x8xf32>
    %24 = arith.addf %21, %23 : vector<2x8xf32>
    %cst_18 = arith.constant dense<0xFF800000> : vector<2xf32>
    %25 = vector.multi_reduction <maximumf>, %24, %cst_18 [1] : vector<2x8xf32> to vector<2xf32>
    %26 = vector.shape_cast %25 : vector<2xf32> to vector<2x1xf32>
    %27 = vector.broadcast %26 : vector<2x1xf32> to vector<2x8xf32>
    %28 = arith.subf %24, %27 : vector<2x8xf32>
    %29 = math.exp %28 : vector<2x8xf32>
    %cst_19 = arith.constant dense<0.000000e+00> : vector<2xf32>
    %30 = vector.multi_reduction <add>, %29, %cst_19 [1] : vector<2x8xf32> to vector<2xf32>
    %31 = vector.shape_cast %30 : vector<2xf32> to vector<2x1xf32>
    %32 = vector.broadcast %31 : vector<2x1xf32> to vector<2x8xf32>
    %33 = arith.divf %29, %32 : vector<2x8xf32>
    %c0_20 = arith.constant 0 : index
    %c0_21 = arith.constant 0 : index
    %34 = vector.load %arg9[%c0_20, %c0_21] : memref<2x8xf32, #tpu.memory_space<vmem>>, vector<2x8xf32>
    tpu.vector_store %arg9[%c0_20, %c0_21], %33 {strides = array<i32>} : memref<2x8xf32, #tpu.memory_space<vmem>>, vector<2x8xf32>,
    %35 = vector.shape_cast %33 : vector<2x8xf32> to vector<2x1x8xf32>
    "tpu.trace_start"() <{level = 10 : i32, message = "bql,bly->bqy"}> : () -> ()
    %cst_22 = arith.constant dense<0.000000e+00> : vector<2x1x32xf32>
    %36 = tpu.matmul %35, %0, %cst_22 {dimension_numbers = #tpu.dot_dimension_numbers<[2], [1], [1], [2], [0, 0, 0, 1, 1, 2], [0], [0]>} : vector<2x1x8xf32>, vector<2x8x32xf32>, vector<2x1x32xf32> -> vector<2x1x32xf32>
    "tpu.trace_stop"() : () -> ()
    %37 = vector.shape_cast %36 : vector<2x1x32xf32> to vector<2x32xf32>
    %c0_23 = arith.constant 0 : index
    %c0_24 = arith.constant 0 : index
    %38 = vector.load %arg10[%c0_23, %c0_24] : memref<2x32xf32, #tpu.memory_space<vmem>>, vector<2x32xf32>
    tpu.vector_store %arg10[%c0_23, %c0_24], %37 {strides = array<i32>} : memref<2x32xf32, #tpu.memory_space<vmem>>, vector<2x32xf32>,
    return
  }
  func.func @transform_0(%arg0: i32) -> (i32, i32) {
    %c0_i32 = arith.constant 0 : i32
    %c0_i32_0 = arith.constant 0 : i32
    return %arg0, %c0_i32 : i32, i32
  }
  func.func @transform_1(%arg0: i32) -> (i32, i32, i32) {
    %c0_i32 = arith.constant 0 : i32
    %c0_i32_0 = arith.constant 0 : i32
    %c0_i32_1 = arith.constant 0 : i32
    return %arg0, %c0_i32, %c0_i32_0 : i32, i32, i32
  }
  func.func @transform_2(%arg0: i32) -> (i32, i32) {
    %c0_i32 = arith.constant 0 : i32
    %c0_i32_0 = arith.constant 0 : i32
    %c0_i32_1 = arith.constant 0 : i32
    return %c0_i32, %c0_i32_0 : i32, i32
  }
  func.func @transform_3(%arg0: i32) -> (i32, i32) {
    %c0_i32 = arith.constant 0 : i32
    %c0_i32_0 = arith.constant 0 : i32
    %c0_i32_1 = arith.constant 0 : i32
    return %c0_i32, %c0_i32_0 : i32, i32
  }
  func.func @transform_4(%arg0: i32) -> (i32, i32) {
    %c0_i32 = arith.constant 0 : i32
    %c0_i32_0 = arith.constant 0 : i32
    %c0_i32_1 = arith.constant 0 : i32
    return %c0_i32, %c0_i32_0 : i32, i32
  }
  func.func @transform_5(%arg0: i32) -> (i32, i32) {
    %c0_i32 = arith.constant 0 : i32
    %c0_i32_0 = arith.constant 0 : i32
    %c0_i32_1 = arith.constant 0 : i32
    return %c0_i32, %c0_i32_0 : i32, i32
  }
  func.func @transform_6(%arg0: i32) -> (i32, i32) {
    %c0_i32 = arith.constant 0 : i32
    %c0_i32_0 = arith.constant 0 : i32
    %c0_i32_1 = arith.constant 0 : i32
    return %c0_i32, %c0_i32_0 : i32, i32
  }
  func.func @transform_7(%arg0: i32) -> (i32, i32) {
    %c0_i32 = arith.constant 0 : i32
    %c0_i32_0 = arith.constant 0 : i32
    %c0_i32_1 = arith.constant 0 : i32
    return %c0_i32, %c0_i32_0 : i32, i32
  }
  func.func @transform_8(%arg0: i32) -> (i32, i32) {
    %c0_i32 = arith.constant 0 : i32
    %c0_i32_0 = arith.constant 0 : i32
    return %arg0, %c0_i32 : i32, i32
  }
  func.func @transform_9(%arg0: i32) -> (i32, i32) {
    %c0_i32 = arith.constant 0 : i32
    %c0_i32_0 = arith.constant 0 : i32
    return %arg0, %c0_i32 : i32, i32
  }
}

</mosaic_0001>

<bundles_post_ra>
// kernel: tpu_custom_call.1
= control target key start
LH: loop header
LB: loop body
LE: loop exit
PB: predicated region body
PF: predicated region fallthrough
CT: control target
= control target key end

     0   :  { %s975_s0 = inlined_call_operand.vmem [shape: f32[2,32], index: 0, kind: input, shape index: {}]   ;;  %s976_s1 = inlined_call_operand.hbm [shape: f32[2,8,32], index: 1, kind: input, shape index: {}]   ;;  %s977_s2 = inlined_call_operand.hbm [shape: f32[32,32], index: 2, kind: input, shape index: {}]   ;;  %s978_s3 = inlined_call_operand.vmem [shape: f32[1,32], index: 3, kind: input, shape index: {}]   ;;  %s979_s4 = inlined_call_operand.hbm [shape: f32[32,32], index: 4, kind: input, shape index: {}]   ;;  %s980_s5 = inlined_call_operand.vmem [shape: f32[1,32], index: 5, kind: input, shape index: {}]   ;;  %s981_s6 = inlined_call_operand.vmem [shape: f32[1,32], index: 6, kind: input, shape index: {}]   ;;  %s982_s7 = inlined_call_operand.<no memory space> [shape: f32[1,1], index: 7, kind: input, shape index: {}]   ;;  %s983_s8 = inlined_call_operand.hbm [shape: f32[2,8], index: 8, kind: output, shape index: {0}]   ;;  %s984_s9 = inlined_call_operand.hbm [shape: f32[2,32], index: 9, kind: output, shape index: {1}]  }
   0x1   :  { %v15_v0 = vstv %s982_s7 }
   0x2   :  { %16 = vst [vmem:[#allocation2] sm:$0x1] %v15_v0 }
   0x3   :  { %17 = vsyncpa [#allocation4], 0 }
   0x4   :  { %18 = vsyncpa [#allocation7], 0 }
   0x5   :  { %19 = vsyncpa [#allocation5], 0 }
   0x6   :  { %20 = vsyncpa [#allocation11], 0  ;;  %s801_s11 = smov [#allocation6]   ;;  %s802_s13 = smov [#allocation3]  }
   0x7   :  { %s40_s12 = sshll.u32 %s801_s11, 4  ;;  %s28_s14 = sshll.u32 %s802_s13, 4  ;;  %s41_s12 = int_to_ptr.vmem [resolvable:$true] %s40_s12  ;;  %s866_s14 = int_to_ptr.vmem [resolvable:$true] %s28_s14 }
   0x8   :  { %s683_s17 = scalar_lea.hbm %s977_s2, 512 }
   0x9   :  { %p684_p0 = scmp.ne.s32.totalorder %s977_s2, %s683_s17  ;;  %p687_p1 = scmp.lt.u32.totalorder %s683_s17, %s977_s2 }
   0xb   :  { %p689_p2 = pnand %p687_p1, %p684_p0 }
   0xd   :  { %692 = shalt.err (!%p689_p2)
}
   0xe   :  { %s693_s21 = scalar_lea.vmem %s41_s12, 512  ;;  %p698_p4 = scmp.lt.s32.totalorder %s41_s12, %s41_s12 }
   0xf   :  { %p694_p3 = scmp.ne.s32.totalorder %s41_s12, %s693_s21  ;;  %p699_p5 = scmp.lt.s32.totalorder %s693_s21, %s693_s21 }
  0x11   :  { %p700_p6 = por %p699_p5, %p698_p4 }
  0x13   :  { %p701_p7 = pnand %p700_p6, %p694_p3 }
  0x15   :  { %704 = shalt.err (!%p701_p7)
}
  0x16   :  { %s803_s22 = smov 128   ;;  %s804_s23 = smov 8  }
  0x17   :  { %46 = dma.hbm_to_vmem [thread:$0]  %s977_s2, 512, %s41_s12, [#allocation7], %s803_s22, %s803_s22, %s804_s23  }
  0x18   :  { %s705_s28 = scalar_lea.hbm %s976_s1, 256 }
  0x19   :  { %p706_p8 = scmp.ne.s32.totalorder %s976_s1, %s705_s28  ;;  %p709_p9 = scmp.lt.u32.totalorder %s705_s28, %s976_s1 }
  0x1b   :  { %p711_p10 = pnand %p709_p9, %p706_p8 }
  0x1d   :  { %714 = shalt.err (!%p711_p10)
}
  0x1e   :  { %s715_s13 = scalar_lea.vmem %s866_s14, 256  ;;  %p720_p12 = scmp.lt.s32.totalorder %s866_s14, %s866_s14 }
  0x1f   :  { %p716_p11 = scmp.ne.s32.totalorder %s866_s14, %s715_s13  ;;  %p721_p13 = scmp.lt.s32.totalorder %s715_s13, %s715_s13 }
  0x21   :  { %p722_p0 = por %p721_p13, %p720_p12 }
  0x23   :  { %p723_p1 = pnand %p722_p0, %p716_p11 }
  0x25   :  { %726 = shalt.err (!%p723_p1)
}
  0x26   :  { %34 = dma.hbm_to_vmem [thread:$0]  %s976_s1, 256, %s866_s14, [#allocation4], %s803_s22, %s803_s22, %s804_s23  }
  0x27   :  { %s805_s15 = smov [#allocation8]   ;;  %s727_s19 = scalar_lea.hbm %s979_s4, 512 }
  0x28   :  { %s54_s16 = sshll.u32 %s805_s15, 4  ;;  %p728_p2 = scmp.ne.s32.totalorder %s979_s4, %s727_s19  ;;  %s55_s16 = int_to_ptr.vmem [resolvable:$true] %s54_s16 }
  0x29   :  { %p731_p3 = scmp.lt.u32.totalorder %s727_s19, %s979_s4 }
  0x2b   :  { %p733_p4 = pnand %p731_p3, %p728_p2 }
  0x2d   :  { %736 = shalt.err (!%p733_p4)
}
  0x2e   :  { %s737_s25 = scalar_lea.vmem %s55_s16, 512  ;;  %p742_p6 = scmp.lt.s32.totalorder %s55_s16, %s55_s16 }
  0x2f   :  { %p738_p5 = scmp.ne.s32.totalorder %s55_s16, %s737_s25  ;;  %p743_p7 = scmp.lt.s32.totalorder %s737_s25, %s737_s25 }
  0x31   :  { %p744_p8 = por %p743_p7, %p742_p6 }
  0x33   :  { %p745_p9 = pnand %p744_p8, %p738_p5 }
  0x35   :  { %748 = shalt.err (!%p745_p9)
}
  0x36   :  { %60 = dma.hbm_to_vmem [thread:$0]  %s979_s4, 512, %s55_s16, [#allocation7], %s803_s22, %s803_s22, %s804_s23  }
  0x37   :  { %793 = dma.done.wait [#allocation4], 256  }
  0x38   :  { %794 = vsyncadd [#allocation4], 4294967040 }
  0x39   :  { %795 = dma.done.wait [#allocation7], 1024  }
  0x3a   :  { %796 = vsyncadd [#allocation7], 4294966272  ;;  %v806_v1 = vmov 0.0|0.0   ;;  %vm807_vm0 = vmmov 0   ;;  %v808_v2 = vmov 0.0   ;;  %v172_v3 = vld [vmem:[#allocation6] sm:$0xff]  ;;  %v260_v22 = vlaneseq }
  0x3b   :  { %655 = vmatprep.subr.bf16.mxu1 %v806_v1  ;;  %634 = vmatprep.mubr.msk.f32.mxu1 %vm807_vm0, %v808_v2  ;;  %v173_v4 = vld [vmem:[#allocation6 + $0x8] sm:$0xff]  ;;  %v78_v5 = vld [vmem:[#allocation8] sm:$0xff]  ;;  %v174_v8 = vld [vmem:[#allocation6 + $0x10] sm:$0xff]  ;;  %vm89_vm1 = vcmask 261120   ;;  %v809_v19 = vmov 0   ;;  %vm330_vm2 = vcmask 1041409  }
  0x3c   :  { %v656_v6 = vpack.c.bf16 %v173_v4, %v172_v3  ;;  %v79_v7 = vld [vmem:[#allocation8 + $0x8] sm:$0xff]  ;;  %v175_v9 = vld [vmem:[#allocation6 + $0x18] sm:$0xff]  ;;  %v80_v11 = vld [vmem:[#allocation8 + $0x10] sm:$0xff]  ;;  %673 = vset.pattern.permute.xlu1 %v809_v19  ;;  %674 = vset.pattern.permute.xlu0 %v809_v19  ;;  %v810_v20 = vmov 1966171168   ;;  %v927_v24 = vshrl.u32 %v260_v22, 7 }
  0x3d   :  { %v647_v10 = vpack.c.bf16 %v79_v7, %v78_v5  ;;  %v81_v12 = vld [vmem:[#allocation8 + $0x18] sm:$0xff]  ;;  %v659_v13 = vpack.c.bf16 %v175_v9, %v174_v8  ;;  %v76_v15 = vld [vmem:[#allocation3] sm:$0xff]  ;;  %v597_v18 = vld [vmem:[#allocation2] ss:$0 sm:$0xff]  ;;  %v258_v21 = vunpack.c.l.s4 %v810_v20  ;;  %v321_v49 = vand.u32 127, %v260_v22 }
  0x3e   :  { %657 = vmatpush3.bf16.msra.mxu1 %v656_v6  ;;  %v651_v14 = vpack.c.bf16 %v81_v12, %v80_v11  ;;  %623 = vmatprep.mubr.msk.f32.mxu0 %vm89_vm1, %v76_v15  ;;  %v171_v16 = vld [vmem:[%s975_s0] sm:$0x3]  ;;  %v77_v17 = vld [vmem:[#allocation3 + $0x8] sm:$0xff]  ;;  %v281_v33 = vsub.s32 0, %v927_v24  ;;  %vm333_vm3 = vcmask 58368   ;;  %v344_v60 = vsub.s32 1, %v927_v24 }
  0x3f   :  { %648 = vmatprep.subr.bf16.mxu0 %v647_v10  ;;  %658 = vmatprep.subr.bf16.mxu1 %v806_v1  ;;  %v259_v23 = vunpack.c.0.s8 %v258_v21  ;;  %v594_v25 = vld [vmem:[%s978_s3] ss:$0 sm:$0xff]  ;;  %v324_v52 = vsub.s32 %v321_v49, %v927_v24  ;;  %vm409_vm4 = vcmask 64512  }
  0x40   :  { %650 = vmatpush3.bf16.msra.mxu0 %v647_v10  ;;  %313 = vperm.xlu1 %673, %v597_v18   ;;  %v591_v31 = vld [vmem:[%s980_s5] ss:$0 sm:$0xff]  ;;  %s811_s5 = smov [#allocation9]  }
  0x41   :  { %652 = vmatprep.subr.bf16.mxu0 %v651_v14  ;;  %v262_v26 = vsub.s32 %v259_v23, %v927_v24  ;;  %v596_v40 = vld [vmem:[%s981_s6] ss:$0 sm:$0xff]  ;;  %s567_s6 = sshll.u32 %s811_s5, 4  ;;  %s568_s6 = int_to_ptr.vmem [resolvable:$true] %s567_s6 }
  0x42   :  { %660 = vmatpush3.bf16.msra.mxu1 %v659_v13  ;;  %s749_s29 = scalar_lea.vmem %s568_s6, 32  ;;  %p754_p11 = scmp.lt.s32.totalorder %s568_s6, %s568_s6 }
  0x43   :  { %642 = vmatprep.subr.mxu1 %v808_v2  ;;  %p750_p10 = scmp.ne.s32.totalorder %s568_s6, %s749_s29  ;;  %p755_p12 = scmp.lt.s32.totalorder %s749_s29, %s749_s29 }
  0x44   :  { %654 = vmatpush3.bf16.msra.mxu0 %v651_v14 }
  0x45   :  { %635 = vmatmul.mubr.msk.f32.vlgmr.msra.gmra.mrb[0].mxu1 %vm89_vm1, %v171_v16  ;;  %637 = vmatprep.subr.mxu0 %v808_v2  ;;  %p756_p13 = por %p755_p12, %p754_p11 }
  0x46   :  { %643 = vmatpush3.msra.mxu1 %v77_v17  ;;  %644 = vmatprep.mubr.msk.f32.mxu1 %vm807_vm0, %v808_v2 }
  0x47   :  { %624 = vmatmul.mubr.msk.f32.vlgmr.msra.gmra.mrb[0].mxu0 %vm89_vm1, %v77_v17  ;;  %p757_p0 = pnand %p756_p13, %p750_p10 }
  0x48   :  { %638 = vmatpush3.msra.mxu0 %v76_v15  ;;  %639 = vmatprep.mubr.msk.f32.mxu0 %vm807_vm0, %v808_v2 }
  0xbf   :  { %v314_v50 = vpop.permute.xlu1 %313 }
 0x118   :  { %v252_v27 = vpop.f32.mrb[0].mxu1 }
 0x119   :  { %v253_v28 = vadd.f32 %v594_v25, %v252_v27  ;;  %v636_v29 = vpop.f32.mrb[1].mxu1 }
 0x11a   :  { %v625_v30 = vpop.f32.mrb[0].mxu0 }
 0x11b   :  { %v263_v32 = vrot.slane %v253_v28, %v262_v26  ;;  %v162_v34 = vpop.f32.mrb[1].mxu0  ;;  %v168_v41 = vadd.f32 %v625_v30, %v591_v31 }
 0x11c   :  { %v163_v37 = vadd.f32 %v591_v31, %v162_v34 }
 0x11d   :  { %v264_v35 = vcombine.high %v263_v32, %v263_v32  ;;  %v271_v36 = vrot.slane %v263_v32, %v262_v26 }
 0x11f   :  { %v278_v38 = vrot.slane %v264_v35, %v262_v26  ;;  %v282_v39 = vrot.slane %v271_v36, %v281_v33 }
 0x121   :  { %v286_v42 = vrot.slane %v278_v38, %v281_v33  ;;  %v289_v43 = vadd.f32 %v282_v39, %v163_v37 }
 0x123   :  { %v290_v44 = vadd.f32 %v286_v42, %v168_v41  ;;  %v298_v45 = vmul.f32 %v596_v40, %v289_v43 }
 0x125   :  { %v300_v46 = vsel %vm89_vm1, %v298_v45, 0.0  ;;  %v299_v47 = vmul.f32 %v596_v40, %v290_v44 }
 0x126   :  { %301 = vadd.xlane.f32.xlu0 %v300_v46 }
 0x127   :  { %v303_v48 = vsel %vm89_vm1, %v299_v47, 0.0 }
 0x12a   :  { %304 = vadd.xlane.f32.xlu0 %v303_v48 }
 0x1b3   :  { %v302_v51 = vpop.xlane.xlu0 %301 }
 0x1b4   :  { %v316_v53 = vadd.f32 %v314_v50, %v302_v51 }
 0x1b6   :  { %v325_v56 = vrot.slane %v316_v53, %v324_v52 }
 0x1b7   :  { %v305_v54 = vpop.xlane.xlu0 %304 }
 0x1b8   :  { %v317_v55 = vadd.f32 %v314_v50, %v305_v54 }
 0x1ba   :  { %v329_v57 = vrot.slane %v317_v55, %v324_v52 }
 0x1bc   :  { %v331_v58 = vsel %vm330_vm2, %v329_v57, %v325_v56 }
 0x1bd   :  { %v334_v59 = vsel %vm333_vm3, %v331_v58, -inf }
 0x1be   :  { %335 = vmax.xlane.f32.xlu1 %v334_v59 }
 0x24b   :  { %v336_v61 = vpop.xlane.xlu1 %335 }
 0x24c   :  { %v341_v62 = vrot.slane %v336_v61, %v281_v33  ;;  %v345_v63 = vrot.slane %v336_v61, %v344_v60 }
 0x24e   :  { %v348_v0 = vsub.f32 %v316_v53, %v341_v62  ;;  %v349_v1 = vsub.f32 %v317_v55, %v345_v63 }
 0x250   :  { %v350_v2 = vmul.f32 1.442695, %v348_v0  ;;  %v352_v3 = vmul.f32 1.442695, %v349_v1 }
 0x252   :  { %675 = vpow2.f32 %v350_v2 }
 0x253   :  { %677 = vpow2.f32 %v352_v3 }
 0x25c   :  { %v676_v4 = vpop.eup %675 }
 0x25d   :  { %v678_v5 = vpop.eup %677  ;;  %357 = vperm.xlu0 %674, %v676_v4  }
 0x25e   :  { %360 = vperm.xlu1 %673, %v678_v5  }
 0x2dc   :  { %v358_v6 = vpop.permute.xlu0 %357 }
 0x2dd   :  { %v361_v7 = vpop.permute.xlu1 %360  ;;  %v365_v8 = vrot.slane %v358_v6, %v324_v52 }
 0x2de   :  { %v369_v9 = vrot.slane %v361_v7, %v324_v52 }
 0x2e0   :  { %v370_v10 = vsel %vm330_vm2, %v369_v9, %v365_v8 }
 0x2e1   :  { %v372_v11 = vsel %vm333_vm3, %v370_v10, 0.0 }
 0x2e2   :  { %373 = vadd.xlane.f32.xlu0 %v372_v11 }
 0x36f   :  { %v374_v12 = vpop.xlane.xlu0 %373 }
 0x370   :  { %v383_v13 = vrot.slane %v374_v12, %v344_v60  ;;  %v379_v14 = vrot.slane %v374_v12, %v281_v33 }
 0x372   :  { %679 = vrcp.f32 %v383_v13 }
 0x373   :  { %681 = vrcp.f32 %v379_v14 }
 0x37c   :  { %v680_v15 = vpop.eup %679 }
 0x37d   :  { %v389_v16 = vmul.f32 %v680_v15, %v678_v5  ;;  %v682_v17 = vpop.eup %681 }
 0x37e   :  { %v387_v18 = vmul.f32 %v682_v17, %v676_v4 }
 0x37f   :  { %396 = vperm.xlu1 %673, %v389_v16  }
 0x383   :  { %393 = vperm.xlu1 %673, %v387_v18  }
 0x3fe   :  { %v397_v19 = vpop.permute.xlu1 %396 }
 0x3ff   :  { %v405_v20 = vrot.slane %v397_v19, %v324_v52 }
 0x401   :  { %645 = vmatmul.mubr.msk.f32.vlgmr.msra.gmra.mrb[2].mxu1 %vm409_vm4, %v405_v20 }
 0x402   :  { %v394_v21 = vpop.permute.xlu1 %393 }
 0x403   :  { %v401_v22 = vrot.slane %v394_v21, %v324_v52 }
 0x405   :  { %640 = vmatmul.mubr.msk.f32.vlgmr.msra.gmra.mrb[2].mxu0 %vm409_vm4, %v401_v22  ;;  %v406_v23 = vsel %vm330_vm2, %v405_v20, %v401_v22 }
 0x406   :  { %408 = vst.msk [vmem:[#allocation9] sm:$0x3] %vm333_vm3, %v406_v23 }
 0x407   :  { %760 = shalt.err (!%p757_p0)
}
 0x408   :  { %s761_s11 = scalar_lea.hbm %s983_s8, 32 }
 0x409   :  { %p762_p1 = scmp.ne.s32.totalorder %s983_s8, %s761_s11  ;;  %p765_p2 = scmp.lt.u32.totalorder %s761_s11, %s983_s8 }
 0x40b   :  { %p767_p3 = pnand %p765_p2, %p762_p1 }
 0x40d   :  { %770 = shalt.err (!%p767_p3)
}
 0x40e   :  { %570 = dma.vmem_to_hbm [thread:$0]  %s568_s6, 32, %s983_s8, [#allocation5]   ;;  %vm559_vm5 = vcmask 254976  }
 0x40f   :  { %s812_s18 = smov [#allocation10]  }
 0x410   :  { %s577_s19 = sshll.u32 %s812_s18, 4  ;;  %s578_s19 = int_to_ptr.vmem [resolvable:$true] %s577_s19 }
 0x411   :  { %s771_s7 = scalar_lea.vmem %s578_s19, 32  ;;  %p776_p5 = scmp.lt.s32.totalorder %s578_s19, %s578_s19 }
 0x412   :  { %p772_p4 = scmp.ne.s32.totalorder %s578_s19, %s771_s7  ;;  %p777_p6 = scmp.lt.s32.totalorder %s771_s7, %s771_s7 }
 0x414   :  { %p778_p7 = por %p777_p6, %p776_p5 }
 0x416   :  { %p779_p8 = pnand %p778_p7, %p772_p4 }
 0x4d4   :  { %v550_v24 = vpop.f32.mrb[2].mxu1 }
 0x4d5   :  { %v646_v25 = vpop.f32.mrb[3].mxu1  ;;  %v556_v26 = vrot.slane %v550_v24, 7 }
 0x4d8   :  { %v478_v27 = vpop.f32.mrb[2].mxu0 }
 0x4d9   :  { %v557_v28 = vsel %vm330_vm2, %v556_v26, %v478_v27  ;;  %v641_v29 = vpop.f32.mrb[3].mxu0 }
 0x4da   :  { %560 = vst.msk [vmem:[#allocation10] sm:$0x3] %vm559_vm5, %v557_v28 }
 0x4db   :  { %782 = shalt.err (!%p779_p8)
}
 0x4dc   :  { %s783_s21 = scalar_lea.hbm %s984_s9, 32 }
 0x4dd   :  { %p784_p9 = scmp.ne.s32.totalorder %s984_s9, %s783_s21  ;;  %p787_p10 = scmp.lt.u32.totalorder %s783_s21, %s984_s9 }
 0x4df   :  { %p789_p11 = pnand %p787_p10, %p784_p9 }
 0x4e1   :  { %792 = shalt.err (!%p789_p11)
}
 0x4e2   :  { %580 = dma.vmem_to_hbm [thread:$0]  %s578_s19, 32, %s984_s9, [#allocation11]  }
 0x4e3   :  { %797 = dma.done.wait [#allocation5], 32  }
 0x4e4   :  { %798 = vsyncadd [#allocation5], 4294967264 }
 0x4e5   :  { %799 = dma.done.wait [#allocation11], 32  }
 0x4e6   :  { %800 = vsyncadd [#allocation11], 4294967264 }
 0x4e7   :  { %587 = vsyncpa [#allocation4], 1 }
 0x4e8   :  { %588 = vsyncpa [#allocation7], 1 }
 0x4e9   :  { %589 = vsyncpa [#allocation5], 1 }
 0x4ea   :  { %590 = vsyncpa [#allocation11], 1 }

</bundles_post_ra>
